<compile_context>
chip_gen: v7x
topology: tpu7x:2x2x1
jax: 0.10.0
libtpu: 0.0.40
codegen_flags: <defaults>
</compile_context>

<pallas_src>
import jax
import jax.numpy as jnp
from jax.experimental import pallas as pl
from jax.experimental.pallas import tpu as pltpu


# ----------------------------------------------------------------------------
# Pallas kernel: fused 3-layer twin-head MLP on one batch tile
# ----------------------------------------------------------------------------
def qnetwork_kernel(sa_ref, w1_ref, b1_ref, w2_ref, b2_ref, w3t_ref, b3t_ref,
                    out_ref):
    x = sa_ref[...]                                                    # (TB, D)

    h = jnp.dot(x, w1_ref[...], preferred_element_type=jnp.float32)   # (TB, 2H)
    h = jnp.maximum(h + b1_ref[...], 0.0)                             # f32 ReLU

    h = jnp.dot(h.astype(w2_ref.dtype), w2_ref[...],
                preferred_element_type=jnp.float32)                   # (TB, 2H)
    h = jnp.maximum(h + b2_ref[...], 0.0)                             # f32 ReLU

    # Lane-dense (2, TB) output: contract the 2H feature axis of the
    # pre-transposed layer-3 weight against the feature axis of h.
    y = jax.lax.dot_general(
        w3t_ref[...], h.astype(w3t_ref.dtype),
        dimension_numbers=(((1,), (1,)), ((), ())),
        preferred_element_type=jnp.float32)                           # (2, TB)
    out_ref[...] = (y + b3t_ref[...]).astype(out_ref.dtype)


# ----------------------------------------------------------------------------
# Parameter packing (done once, outside the kernel)
# ----------------------------------------------------------------------------
def pack_params(p, dtype=jnp.bfloat16):
    """Pack the six Linear layers of the two Q heads into three fused weights.

    Weights are stored in `dtype` (bf16 by default: native MXU input dtype and
    half the HBM bytes); biases stay f32 for the f32 epilogue.
    NOTE: biases here are shaped (1, H); reshape (H,) PyTorch biases on import.
    """
    h = p['w1'].shape[1]
    f32 = jnp.float32
    zhh = jnp.zeros((h, h), f32)
    zh1 = jnp.zeros((h, 1), f32)
    w3_blk = jnp.concatenate(
        [jnp.concatenate([p['w3'], zh1], axis=1),
         jnp.concatenate([zh1, p['w6']], axis=1)], axis=0)             # (2H, 2)
    return {
        # layer 1: sa @ [W1 | W4]
        'w1p': jnp.concatenate([p['w1'], p['w4']], axis=1).astype(dtype),   # (D, 2H)
        'b1p': jnp.concatenate([p['b1'], p['b4']], axis=1).astype(f32),     # (1, 2H)
        # layer 2: blockdiag(W2, W5)
        'w2p': jnp.concatenate(
            [jnp.concatenate([p['w2'], zhh], axis=1),
             jnp.concatenate([zhh, p['w5']], axis=1)], axis=0).astype(dtype),  # (2H, 2H)
        'b2p': jnp.concatenate([p['b2'], p['b5']], axis=1).astype(f32),     # (1, 2H)
        # layer 3: blockdiag(w3, w6), pre-transposed for the (2, TB) output
        'w3t': w3_blk.T.astype(dtype),                                      # (2, 2H)
        'b3t': jnp.concatenate([p['b3'], p['b6']], axis=1).T.astype(f32),   # (2, 1)
    }


def _round_up(x, m):
    return (x + m - 1) // m * m


# ----------------------------------------------------------------------------
# Wrapper: grid over batch tiles, weights resident (constant index_map)
# ----------------------------------------------------------------------------
@jax.jit
def qnetwork_forward(sa, packed):
    """sa: (B, num_inputs). Returns (x1, x2), each (B, 1) float32."""
    b, d = sa.shape
    two_h = packed['w1p'].shape[1]
    compute_dtype = packed['w1p'].dtype
    sa = sa.astype(compute_dtype)                      # stream dtype = weight dtype

    # Batch tile: as large as practical (amortizes the ~0.35us per-step
    # overhead and MXU fill/drain), capped at 1024 rows.  For large B keep the
    # grid >= 2 steps so the "parallel" axis can be sharded across v7x's two
    # TensorCores.  For small B a single full-dims block avoids any (8,128)
    # alignment requirement and needs no padding.
    TB_MAX = 1024
    if b <= 256:
        tb = b                                         # single resident tile
    else:
        tb = min(TB_MAX, _round_up(pl.cdiv(b, 2), 128))
    grid = (pl.cdiv(b, tb),)                           # edge block masked by Pallas

    def const_spec(arr):
        # Whole (small) weight/bias resident in VMEM for all grid steps.
        return pl.BlockSpec(arr.shape, lambda i: (0, 0))

    itemsize = jnp.dtype(compute_dtype).itemsize
    flops = 2 * b * (d * two_h + two_h * two_h + two_h * 2)
    bytes_accessed = (b * d * itemsize                                   # sa
                      + (d * two_h + two_h * two_h + 2 * two_h) * itemsize  # weights
                      + 4 * (two_h + two_h + 2)                          # biases
                      + 4 * 2 * b)                                       # output

    out = pl.pallas_call(
        qnetwork_kernel,
        out_shape=jax.ShapeDtypeStruct((2, b), jnp.float32),   # lane-dense slab
        grid=grid,
        in_specs=[
            pl.BlockSpec((tb, d), lambda i: (i, 0)),           # sa batch tile
            const_spec(packed['w1p']), const_spec(packed['b1p']),
            const_spec(packed['w2p']), const_spec(packed['b2p']),
            const_spec(packed['w3t']), const_spec(packed['b3t']),
        ],
        out_specs=pl.BlockSpec((2, tb), lambda i: (0, i)),
        compiler_params=pltpu.CompilerParams(
            dimension_semantics=("parallel",)),
        cost_estimate=pl.CostEstimate(
            flops=flops, transcendentals=0, bytes_accessed=bytes_accessed),
    )(sa, packed['w1p'], packed['b1p'], packed['w2p'], packed['b2p'],
      packed['w3t'], packed['b3t'])

    x1 = out[0].reshape(b, 1)
    x2 = out[1].reshape(b, 1)
    return x1, x2


# ----------------------------------------------------------------------------
# Pure-JAX reference (unpacked params).  With compute_dtype=float32 it is the
# literal transcription of the PyTorch module; with bfloat16 it mirrors the
# kernel's cast points (bf16 matmul inputs, f32 accumulation/epilogue).
# ----------------------------------------------------------------------------
def qnetwork_reference(sa, p, compute_dtype=jnp.float32):
    cd = compute_dtype

    def linear(x, w, b):
        return jnp.dot(x.astype(cd), w.astype(cd),
                       preferred_element_type=jnp.float32) + b

    x1 = jnp.maximum(linear(sa, p['w1'], p['b1']), 0.0)
    x1 = jnp.maximum(linear(x1, p['w2'], p['b2']), 0.0)
    x1 = linear(x1, p['w3'], p['b3'])
    x2 = jnp.maximum(linear(sa, p['w4'], p['b4']), 0.0)
    x2 = jnp.maximum(linear(x2, p['w5'], p['b5']), 0.0)
    x2 = linear(x2, p['w6'], p['b6'])
    return x1, x2


# ----------------------------------------------------------------------------
# Deterministic synthetic parameter init (xavier_uniform weights, zero biases,
# matching weights_init_; biases stored as (1, H) row vectors)
# ----------------------------------------------------------------------------
def init_params(key, num_inputs, hidden_dim):
    keys = jax.random.split(key, 6)

    def xavier(kk, shape):
        fan_in, fan_out = shape
        a = jnp.sqrt(6.0 / (fan_in + fan_out))
        return jax.random.uniform(kk, shape, jnp.float32, -a, a)

    d, h = num_inputs, hidden_dim
    zeros = lambda n: jnp.zeros((1, n), jnp.float32)
    return {
        'w1': xavier(keys[0], (d, h)), 'b1': zeros(h),
        'w2': xavier(keys[1], (h, h)), 'b2': zeros(h),
        'w3': xavier(keys[2], (h, 1)), 'b3': zeros(1),
        'w4': xavier(keys[3], (d, h)), 'b4': zeros(h),
        'w5': xavier(keys[4], (h, h)), 'b5': zeros(h),
        'w6': xavier(keys[5], (h, 1)), 'b6': zeros(1),
    }


if __name__ == "__main__":
    import numpy as np

    num_inputs, hidden_dim = 24, 32      # e.g. state_dim + action_dim = 24
    batch = 2                            # NOTE: benchmark at B >= 512, not here

    key = jax.random.PRNGKey(0)
    ksa, kp = jax.random.split(key)
    sa = jax.random.normal(ksa, (batch, num_inputs), jnp.float32)
    params = init_params(kp, num_inputs, hidden_dim)

    # --- f32 path: exact semantics of the PyTorch module ---------------------
    packed_f32 = pack_params(params, dtype=jnp.float32)
    x1, x2 = jax.block_until_ready(qnetwork_forward(sa, packed_f32))
    x1_ref, x2_ref = qnetwork_reference(sa, params)
    np.testing.assert_allclose(np.asarray(x1), np.asarray(x1_ref),
                               rtol=1e-5, atol=1e-5)
    np.testing.assert_allclose(np.asarray(x2), np.asarray(x2_ref),
                               rtol=1e-5, atol=1e-5)

    # --- bf16-streaming path (production config for the mem-bound regime) ----
    packed_bf16 = pack_params(params, dtype=jnp.bfloat16)
    x1b, x2b = jax.block_until_ready(qnetwork_forward(sa, packed_bf16))
    x1_bref, x2_bref = qnetwork_reference(sa, params, compute_dtype=jnp.bfloat16)
    np.testing.assert_allclose(np.asarray(x1b), np.asarray(x1_bref),
                               rtol=1e-3, atol=1e-3)
    np.testing.assert_allclose(np.asarray(x2b), np.asarray(x2_bref),
                               rtol=1e-3, atol=1e-3)

    print("KERNEL_OK")
</pallas_src>

<mosaic_0001>
module attributes {stable_mosaic.version = 11 : i64} {
  func.func @qnetwork_kernel(%arg0: i32, %arg1: memref<2x24xf32, #tpu.memory_space<vmem>>, %arg2: memref<24x64xf32, #tpu.memory_space<vmem>>, %arg3: memref<1x64xf32, #tpu.memory_space<vmem>>, %arg4: memref<64x64xf32, #tpu.memory_space<vmem>>, %arg5: memref<1x64xf32, #tpu.memory_space<vmem>>, %arg6: memref<2x64xf32, #tpu.memory_space<vmem>>, %arg7: memref<2x1xf32, #tpu.memory_space<vmem>>, %arg8: memref<2x2xf32, #tpu.memory_space<vmem>>) attributes {dimension_semantics = [#tpu.dimension_semantics<parallel>], iteration_bounds = array<i64: 1>, scalar_prefetch = 0 : i64, scratch_operands = 0 : i64, tpu.core_type = #tpu.core_type<tc>, window_params = [{transform_indices = @transform_0, window_bounds = array<i64: 2, 24>}, {pipeline_mode = #tpu.pipeline_mode<synchronous>, transform_indices = @transform_1, window_bounds = array<i64: 24, 64>}, {pipeline_mode = #tpu.pipeline_mode<synchronous>, transform_indices = @transform_2, window_bounds = array<i64: 1, 64>}, {pipeline_mode = #tpu.pipeline_mode<synchronous>, transform_indices = @transform_3, window_bounds = array<i64: 64, 64>}, {pipeline_mode = #tpu.pipeline_mode<synchronous>, transform_indices = @transform_4, window_bounds = array<i64: 1, 64>}, {pipeline_mode = #tpu.pipeline_mode<synchronous>, transform_indices = @transform_5, window_bounds = array<i64: 2, 64>}, {pipeline_mode = #tpu.pipeline_mode<synchronous>, transform_indices = @transform_6, window_bounds = array<i64: 2, 1>}, {transform_indices = @transform_7, window_bounds = array<i64: 2, 2>}]} {
    %c0 = arith.constant 0 : index
    %c0_0 = arith.constant 0 : index
    %0 = vector.load %arg1[%c0, %c0_0] : memref<2x24xf32, #tpu.memory_space<vmem>>, vector<2x24xf32>
    %c0_1 = arith.constant 0 : index
    %c0_2 = arith.constant 0 : index
    %1 = vector.load %arg2[%c0_1, %c0_2] : memref<24x64xf32, #tpu.memory_space<vmem>>, vector<24x64xf32>
    %cst = arith.constant dense<0.000000e+00> : vector<2x64xf32>
    %2 = tpu.matmul %0, %1, %cst {dimension_numbers = #tpu.dot_dimension_numbers<[1], [0], [0], [1], [0, 0, 1, 1], [], []>} : vector<2x24xf32>, vector<24x64xf32>, vector<2x64xf32> -> vector<2x64xf32>
    %c0_3 = arith.constant 0 : index
    %c0_4 = arith.constant 0 : index
    %3 = vector.load %arg3[%c0_3, %c0_4] : memref<1x64xf32, #tpu.memory_space<vmem>>, vector<1x64xf32>
    %4 = vector.broadcast %3 : vector<1x64xf32> to vector<2x64xf32>
    %5 = arith.addf %2, %4 : vector<2x64xf32>
    %cst_5 = arith.constant 0.000000e+00 : f32
    %6 = vector.broadcast %cst_5 : f32 to vector<2x64xf32>
    %7 = arith.maximumf %5, %6 : vector<2x64xf32>
    %c0_6 = arith.constant 0 : index
    %c0_7 = arith.constant 0 : index
    %8 = vector.load %arg4[%c0_6, %c0_7] : memref<64x64xf32, #tpu.memory_space<vmem>>, vector<64x64xf32>
    %cst_8 = arith.constant dense<0.000000e+00> : vector<2x64xf32>
    %9 = tpu.matmul %7, %8, %cst_8 {dimension_numbers = #tpu.dot_dimension_numbers<[1], [0], [0], [1], [0, 0, 1, 1], [], []>} : vector<2x64xf32>, vector<64x64xf32>, vector<2x64xf32> -> vector<2x64xf32>
    %c0_9 = arith.constant 0 : index
    %c0_10 = arith.constant 0 : index
    %10 = vector.load %arg5[%c0_9, %c0_10] : memref<1x64xf32, #tpu.memory_space<vmem>>, vector<1x64xf32>
    %11 = vector.broadcast %10 : vector<1x64xf32> to vector<2x64xf32>
    %12 = arith.addf %9, %11 : vector<2x64xf32>
    %cst_11 = arith.constant 0.000000e+00 : f32
    %13 = vector.broadcast %cst_11 : f32 to vector<2x64xf32>
    %14 = arith.maximumf %12, %13 : vector<2x64xf32>
    %c0_12 = arith.constant 0 : index
    %c0_13 = arith.constant 0 : index
    %15 = vector.load %arg6[%c0_12, %c0_13] : memref<2x64xf32, #tpu.memory_space<vmem>>, vector<2x64xf32>
    %cst_14 = arith.constant dense<0.000000e+00> : vector<2x2xf32>
    %16 = tpu.matmul %15, %14, %cst_14 {dimension_numbers = #tpu.dot_dimension_numbers<[1], [1], [0], [0], [0, 0, 1, 0], [], []>} : vector<2x64xf32>, vector<2x64xf32>, vector<2x2xf32> -> vector<2x2xf32>
    %c0_15 = arith.constant 0 : index
    %c0_16 = arith.constant 0 : index
    %17 = vector.load %arg7[%c0_15, %c0_16] : memref<2x1xf32, #tpu.memory_space<vmem>>, vector<2x1xf32>
    %18 = vector.broadcast %17 : vector<2x1xf32> to vector<2x2xf32>
    %19 = arith.addf %16, %18 : vector<2x2xf32>
    %c0_17 = arith.constant 0 : index
    %c0_18 = arith.constant 0 : index
    %20 = vector.load %arg8[%c0_17, %c0_18] : memref<2x2xf32, #tpu.memory_space<vmem>>, vector<2x2xf32>
    tpu.vector_store %arg8[%c0_17, %c0_18], %19 {strides = array<i32>} : memref<2x2xf32, #tpu.memory_space<vmem>>, vector<2x2xf32>,
    return
  }
  func.func @transform_0(%arg0: i32) -> (i32, i32) {
    %c0_i32 = arith.constant 0 : i32
    %c0_i32_0 = arith.constant 0 : i32
    return %arg0, %c0_i32 : i32, i32
  }
  func.func @transform_1(%arg0: i32) -> (i32, i32) {
    %c0_i32 = arith.constant 0 : i32
    %c0_i32_0 = arith.constant 0 : i32
    %c0_i32_1 = arith.constant 0 : i32
    return %c0_i32, %c0_i32_0 : i32, i32
  }
  func.func @transform_2(%arg0: i32) -> (i32, i32) {
    %c0_i32 = arith.constant 0 : i32
    %c0_i32_0 = arith.constant 0 : i32
    %c0_i32_1 = arith.constant 0 : i32
    return %c0_i32, %c0_i32_0 : i32, i32
  }
  func.func @transform_3(%arg0: i32) -> (i32, i32) {
    %c0_i32 = arith.constant 0 : i32
    %c0_i32_0 = arith.constant 0 : i32
    %c0_i32_1 = arith.constant 0 : i32
    return %c0_i32, %c0_i32_0 : i32, i32
  }
  func.func @transform_4(%arg0: i32) -> (i32, i32) {
    %c0_i32 = arith.constant 0 : i32
    %c0_i32_0 = arith.constant 0 : i32
    %c0_i32_1 = arith.constant 0 : i32
    return %c0_i32, %c0_i32_0 : i32, i32
  }
  func.func @transform_5(%arg0: i32) -> (i32, i32) {
    %c0_i32 = arith.constant 0 : i32
    %c0_i32_0 = arith.constant 0 : i32
    %c0_i32_1 = arith.constant 0 : i32
    return %c0_i32, %c0_i32_0 : i32, i32
  }
  func.func @transform_6(%arg0: i32) -> (i32, i32) {
    %c0_i32 = arith.constant 0 : i32
    %c0_i32_0 = arith.constant 0 : i32
    %c0_i32_1 = arith.constant 0 : i32
    return %c0_i32, %c0_i32_0 : i32, i32
  }
  func.func @transform_7(%arg0: i32) -> (i32, i32) {
    %c0_i32 = arith.constant 0 : i32
    %c0_i32_0 = arith.constant 0 : i32
    return %c0_i32, %arg0 : i32, i32
  }
}

</mosaic_0001>

<bundles_post_ra>
// kernel: qnetwork_forward.1
= control target key start
LH: loop header
LB: loop body
LE: loop exit
PB: predicated region body
PF: predicated region fallthrough
CT: control target
= control target key end

     0   :  { %12 = vsyncpa [#allocation3], 0  ;;  %s540_s0 = inlined_call_operand.vmem [shape: f32[2,24], index: 0, kind: input, shape index: {}]   ;;  %s541_s1 = inlined_call_operand.hbm [shape: f32[24,64], index: 1, kind: input, shape index: {}]   ;;  %s542_s2 = inlined_call_operand.vmem [shape: f32[1,64], index: 2, kind: input, shape index: {}]   ;;  %s543_s3 = inlined_call_operand.hbm [shape: f32[64,64], index: 3, kind: input, shape index: {}]   ;;  %s544_s4 = inlined_call_operand.vmem [shape: f32[1,64], index: 4, kind: input, shape index: {}]   ;;  %s545_s5 = inlined_call_operand.vmem [shape: f32[2,64], index: 5, kind: input, shape index: {}]   ;;  %s546_s6 = inlined_call_operand.vmem [shape: f32[2,1], index: 6, kind: input, shape index: {}]   ;;  %s547_s7 = inlined_call_operand.vmem [shape: f32[2,2], index: 7, kind: output, shape index: {}]  }
   0x1   :  { %13 = vsyncpa [#allocation5], 0  ;;  %s447_s24 = smov [#allocation2]   ;;  %s399_s28 = scalar_lea.hbm %s541_s1, 384 }
   0x2   :  { %s21_s25 = sshll.u32 %s447_s24, 4  ;;  %p400_p0 = scmp.ne.s32.totalorder %s541_s1, %s399_s28  ;;  %s22_s25 = int_to_ptr.vmem [resolvable:$true] %s21_s25 }
   0x3   :  { %p403_p1 = scmp.lt.u32.totalorder %s399_s28, %s541_s1 }
   0x5   :  { %p405_p2 = pnand %p403_p1, %p400_p0 }
   0x7   :  { %408 = shalt.err (!%p405_p2)
}
   0x8   :  { %s409_s10 = scalar_lea.vmem %s22_s25, 384  ;;  %p414_p4 = scmp.lt.s32.totalorder %s22_s25, %s22_s25 }
   0x9   :  { %p410_p3 = scmp.ne.s32.totalorder %s22_s25, %s409_s10  ;;  %p415_p5 = scmp.lt.s32.totalorder %s409_s10, %s409_s10 }
   0xb   :  { %p416_p6 = por %p415_p5, %p414_p4 }
   0xd   :  { %p417_p7 = pnand %p416_p6, %p410_p3 }
   0xf   :  { %420 = shalt.err (!%p417_p7)
}
  0x10   :  { %s448_s11 = smov 128   ;;  %s449_s12 = smov 8  }
  0x11   :  { %27 = dma.hbm_to_vmem [thread:$0]  %s541_s1, 384, %s22_s25, [#allocation3], %s448_s11, %s448_s11, %s449_s12  }
  0x12   :  { %s450_s15 = smov [#allocation4]   ;;  %s421_s19 = scalar_lea.hbm %s543_s3, 1024 }
  0x13   :  { %s35_s16 = sshll.u32 %s450_s15, 4  ;;  %p422_p8 = scmp.ne.s32.totalorder %s543_s3, %s421_s19  ;;  %s36_s16 = int_to_ptr.vmem [resolvable:$true] %s35_s16 }
  0x14   :  { %p425_p9 = scmp.lt.u32.totalorder %s421_s19, %s543_s3 }
  0x16   :  { %p427_p10 = pnand %p425_p9, %p422_p8 }
  0x18   :  { %430 = shalt.err (!%p427_p10)
}
  0x19   :  { %s431_s24 = scalar_lea.vmem %s36_s16, 1024  ;;  %p436_p12 = scmp.lt.s32.totalorder %s36_s16, %s36_s16 }
  0x1a   :  { %p432_p11 = scmp.ne.s32.totalorder %s36_s16, %s431_s24  ;;  %p437_p13 = scmp.lt.s32.totalorder %s431_s24, %s431_s24 }
  0x1c   :  { %p438_p0 = por %p437_p13, %p436_p12 }
  0x1e   :  { %p439_p1 = pnand %p438_p0, %p432_p11 }
  0x20   :  { %442 = shalt.err (!%p439_p1)
}
  0x21   :  { %41 = dma.hbm_to_vmem [thread:$0]  %s543_s3, 1024, %s36_s16, [#allocation5], %s448_s11, %s448_s11, %s449_s12  }
  0x22   :  { %443 = dma.done.wait [#allocation3], 384  }
  0x23   :  { %444 = vsyncadd [#allocation3], 4294966912 }
  0x24   :  { %445 = dma.done.wait [#allocation5], 1024  }
  0x25   :  { %446 = vsyncadd [#allocation5], 4294966272  ;;  %v451_v0 = vmov 0.0|0.0   ;;  %vm452_vm0 = vmmov 0   ;;  %v453_v1 = vmov 0.0   ;;  %v55_v2 = vld [vmem:[#allocation2] sm:$0xff] }
  0x26   :  { %375 = vmatprep.subr.bf16.mxu0 %v451_v0  ;;  %348 = vmatprep.mubr.msk.f32.mxu0 %vm452_vm0, %v453_v1  ;;  %v56_v3 = vld [vmem:[#allocation2 + $0x8] sm:$0xff]  ;;  %v140_v5 = vld [vmem:[#allocation4] sm:$0xff]  ;;  %v141_v6 = vld [vmem:[#allocation4 + $0x8] sm:$0xff]  ;;  %vm65_vm1 = vcmask 195584   ;;  %vm155_vm2 = vcmask 523264   ;;  %v454_v25 = vmov 0  }
  0x27   :  { %378 = vmatprep.subr.bf16.mxu1 %v451_v0  ;;  %367 = vmatprep.mubr.msk.f32.mxu1 %vm452_vm0, %v453_v1  ;;  %v376_v4 = vpack.c.bf16 %v56_v3, %v55_v2  ;;  %v379_v7 = vpack.c.bf16 %v141_v6, %v140_v5  ;;  %v142_v8 = vld [vmem:[#allocation4 + $0x10] sm:$0xff]  ;;  %v143_v9 = vld [vmem:[#allocation4 + $0x18] sm:$0xff]  ;;  %v54_v12 = vld [vmem:[%s540_s0] sm:$0x3]  ;;  %vm313_vm3 = vcmask 9216  }
  0x28   :  { %v57_v10 = vld [vmem:[#allocation2 + $0x10] sm:$0xff]  ;;  %v382_v11 = vpack.c.bf16 %v143_v9, %v142_v8  ;;  %v144_v13 = vld [vmem:[#allocation4 + $0x20] sm:$0xff]  ;;  %v145_v14 = vld [vmem:[#allocation4 + $0x28] sm:$0xff]  ;;  %398 = vset.pattern.permute.xlu0 %v454_v25 }
  0x29   :  { %377 = vmatpush3.bf16.msra.mxu0 %v376_v4  ;;  %380 = vmatpush3.bf16.msra.mxu1 %v379_v7  ;;  %v385_v15 = vpack.c.bf16 %v145_v14, %v144_v13  ;;  %v146_v16 = vld [vmem:[#allocation4 + $0x30] sm:$0xff]  ;;  %v147_v17 = vld [vmem:[#allocation4 + $0x38] sm:$0xff]  ;;  %v321_v19 = vld [vmem:[%s542_s2] ss:$0 sm:$0xff] }
  0x2a   :  { %346 = vmatprep.subr.mxu0 %v453_v1  ;;  %381 = vmatprep.subr.bf16.mxu1 %v451_v0  ;;  %v388_v18 = vpack.c.bf16 %v147_v17, %v146_v16  ;;  %v231_v24 = vld [vmem:[%s546_s6] sm:$0x3] }
  0x2b   :  { %234 = vperm.xlu0 %398, %v231_v24   ;;  %v323_v26 = vld [vmem:[%s544_s4] ss:$0 sm:$0xff] }
  0x2c   :  { %v230_v31 = vld [vmem:[%s545_s5] sm:$0x3] }
  0x2d   :  { %347 = vmatpush3.msra.mxu0 %v57_v10  ;;  %383 = vmatpush3.bf16.msra.mxu1 %v382_v11 }
  0x2e   :  { %349 = vmatmul.mubr.msk.f32.vlgmr.msra.gmra.mrb[0].mxu0 %vm65_vm1, %v54_v12  ;;  %384 = vmatprep.subr.bf16.mxu1 %v451_v0 }
  0x2f   :  { %370 = vmatprep.subr.mxu0 %v453_v1  ;;  %372 = vmatprep.mubr.msk.f32.mxu0 %vm452_vm0, %v453_v1 }
  0x31   :  { %386 = vmatpush3.bf16.msra.mxu1 %v385_v15 }
  0x32   :  { %387 = vmatprep.subr.bf16.mxu1 %v451_v0 }
  0x35   :  { %389 = vmatpush3.bf16.msra.mxu1 %v388_v18 }
  0xaa   :  { %v235_v32 = vpop.permute.xlu0 %234 }
 0x101   :  { %v135_v20 = vpop.f32.mrb[0].mxu0 }
 0x102   :  { %v136_v21 = vadd.f32 %v321_v19, %v135_v20  ;;  %v350_v22 = vpop.f32.mrb[1].mxu0 }
 0x104   :  { %v139_v23 = vmax.f32 %v136_v21, 0.0 }
 0x106   :  { %368 = vmatmul.mubr.msk.f32.vlgmr.msra.gmra.mrb[0].mxu1 %vm155_vm2, %v139_v23 }
 0x1d9   :  { %v225_v27 = vpop.f32.mrb[0].mxu1 }
 0x1da   :  { %v226_v28 = vadd.f32 %v323_v26, %v225_v27  ;;  %v369_v29 = vpop.f32.mrb[1].mxu1 }
 0x1dc   :  { %v229_v30 = vmax.f32 %v226_v28, 0.0 }
 0x1de   :  { %371 = vmatpush3.xpose.msk.msra.mxu0 %vm155_vm2, %v229_v30 }
 0x1e1   :  { %373 = vmatmul.mubr.msk.f32.vlgmr.msra.gmra.mrb[2].mxu0 %vm155_vm2, %v230_v31 }
 0x2b4   :  { %v309_v33 = vpop.f32.mrb[2].mxu0 }
 0x2b5   :  { %v310_v34 = vadd.f32 %v309_v33, %v235_v32  ;;  %v374_v35 = vpop.f32.mrb[3].mxu0 }
 0x2b7   :  { %314 = vst.msk [vmem:[%s547_s7] sm:$0x3] %vm313_vm3, %v310_v34 }
 0x2b8   :  { %319 = vsyncpa [#allocation3], 1 }
 0x2b9   :  { %320 = vsyncpa [#allocation5], 1 }

</bundles_post_ra>
